<compile_context>
chip_gen: v6e
topology: v6e:2x2x1
jax: 0.10.0
libtpu: 0.0.40
codegen_flags: <defaults>
</compile_context>

<pallas_src>
import functools

import jax
import jax.numpy as jnp
import numpy as np
from jax.experimental import pallas as pl
from jax.experimental.pallas import tpu as pltpu

OUT_CHANNELS = 256
BN_EPS = 1e-5
_LANE = 128
_DEFAULT_TN = 2048                    # spatial (lane) tile; sweep 2048-4096
_VMEM_LIMIT_BYTES = 32 * 1024 * 1024  # safe on v5e/v6e (128 MiB) and v7x (64 MiB)


def _fusion_kernel(w_ref, b_ref, x_ref, acc_ref, o_ref):
    # w_ref:   (Cout, Cin)   BN-folded 1x1 conv weight (VMEM resident)
    # b_ref:   (Cout, 1)     BN-folded bias            (VMEM resident)
    # x_ref:   (Cin, TN)     NCHW-native activations (spatial on lanes)
    # acc_ref: (Cout, TN)    running fused accumulator tile (aliased to out)
    # o_ref:   (Cout, TN)    output = acc + relu(W @ x + b)
    y = jnp.dot(w_ref[...], x_ref[...], preferred_element_type=jnp.float32)
    y = jnp.maximum(y + b_ref[...], 0.0)               # bias + ReLU
    o_ref[...] = (y + acc_ref[...]).astype(o_ref.dtype)


def _device_defaults():
    """Per-generation (TN, vmem_limit).  v7x: bigger tile, but VMEM is 64 MiB."""
    try:
        kind = jax.devices()[0].device_kind.lower()
    except Exception:  # pragma: no cover - defensive only
        kind = ""
    if "v7" in kind:
        return 4096, 48 * 1024 * 1024
    return _DEFAULT_TN, _VMEM_LIMIT_BYTES


def _pick_spatial_tile(hw, tn_pref):
    """Largest lane-aligned tile <= tn_pref; prefer one that divides hw exactly."""
    if hw <= tn_pref:
        return hw                                   # full-extent block is always legal
    tn_pref = max(_LANE, (tn_pref // _LANE) * _LANE)
    # Snap to a multiple of 128 that divides hw (no masked partial last tile),
    # but never shrink below half the preferred size.
    tn = tn_pref
    while tn >= max(_LANE, tn_pref // 2):
        if hw % tn == 0:
            return tn
        tn -= _LANE
    return tn_pref                                  # Pallas masks the remainder tile


@functools.partial(jax.jit,
                   static_argnames=("tn", "vmem_limit"),
                   donate_argnums=(3,))
def _fused_adapter_add(w_folded, b_folded, feat, acc, *,
                       tn=_DEFAULT_TN, vmem_limit=_VMEM_LIMIT_BYTES):
    """acc[B,Cout,H,W] += relu(BN(conv1x1(feat[B,Cin,H,W]))), NCHW-native, in place."""
    B, cin, H, W = feat.shape
    cout = w_folded.shape[0]
    hw = H * W

    # Free reshapes (contiguous, no transpose): NCHW -> (B, C, H*W).
    x3 = feat.reshape(B, cin, hw)
    acc3 = acc.reshape(B, cout, hw)

    TN = _pick_spatial_tile(hw, tn)
    grid = (B, pl.cdiv(hw, TN))         # partial last tile (if any) handled by Pallas

    cost = pl.CostEstimate(
        flops=2 * B * hw * cin * cout,
        transcendentals=0,
        bytes_accessed=4 * B * hw * (cin + 2 * cout) + 4 * cout * (cin + 1),
    )

    out3 = pl.pallas_call(
        _fusion_kernel,
        out_shape=jax.ShapeDtypeStruct((B, cout, hw), acc.dtype),
        grid_spec=pltpu.PrefetchScalarGridSpec(
            num_scalar_prefetch=0,
            grid=grid,
            in_specs=[
                pl.BlockSpec((cout, cin), lambda b, n: (0, 0)),          # weight
                pl.BlockSpec((cout, 1), lambda b, n: (0, 0)),            # bias
                pl.BlockSpec((None, cin, TN), lambda b, n: (b, 0, n)),   # feat tile
                pl.BlockSpec((None, cout, TN), lambda b, n: (b, 0, n)),  # acc tile
            ],
            out_specs=pl.BlockSpec((None, cout, TN), lambda b, n: (b, 0, n)),
        ),
        input_output_aliases={3: 0},    # acc updated in place (donated by the jit)
        compiler_params=pltpu.CompilerParams(
            dimension_semantics=("parallel", "parallel"),
            vmem_limit_bytes=vmem_limit,
        ),
        cost_estimate=cost,
    )(w_folded, b_folded, x3, acc3)

    return out3.reshape(B, cout, H, W)


def _make_adapter_params(key, cin, cout):
    """Deterministic parameters for Conv2d(cin, cout, 1) + BatchNorm2d(cout)."""
    k_w, k_b, k_g, k_be, k_m, k_v = jax.random.split(key, 6)
    conv_w = 0.05 * jax.random.normal(k_w, (cout, cin), jnp.float32)  # 1x1 kernel squeezed
    conv_b = 0.05 * jax.random.normal(k_b, (cout,), jnp.float32)
    bn_gamma = 1.0 + 0.1 * jax.random.normal(k_g, (cout,), jnp.float32)
    bn_beta = 0.1 * jax.random.normal(k_be, (cout,), jnp.float32)
    bn_mean = 0.1 * jax.random.normal(k_m, (cout,), jnp.float32)
    bn_var = jnp.abs(1.0 + 0.1 * jax.random.normal(k_v, (cout,), jnp.float32))
    return dict(conv_w=conv_w, conv_b=conv_b, gamma=bn_gamma, beta=bn_beta,
                mean=bn_mean, var=bn_var)


def _fold_bn(params):
    """Fold eval-mode BatchNorm into the 1x1 conv -> (w [Cout,Cin], b [Cout,1])."""
    scale = params["gamma"] / jnp.sqrt(params["var"] + BN_EPS)        # [Cout]
    w_folded = params["conv_w"] * scale[:, None]                      # [Cout, Cin]
    b_folded = (params["conv_b"] - params["mean"]) * scale + params["beta"]
    return w_folded, b_folded[:, None]                                # [Cout,Cin], [Cout,1]


class SimpleHighResFusionPallas:
    """NOTE: fused_accumulator is DONATED (updated in place); do not reuse it
    after calling — use the returned array instead."""

    def __init__(self, out_channels=OUT_CHANNELS, seed=0):
        self.out_channels = out_channels
        key = jax.random.PRNGKey(seed)
        k32, k64 = jax.random.split(key)
        self.params_32 = _make_adapter_params(k32, 32, out_channels)
        self.params_64 = _make_adapter_params(k64, 64, out_channels)

    def __call__(self, feat, fused_accumulator):
        # feat: [B, Cin, H, W]; fused_accumulator: [B, out_channels, H, W]
        in_channels = feat.shape[1]
        if in_channels == 32:
            params = self.params_32
        elif in_channels == 64:
            params = self.params_64
        else:
            raise ValueError(f"Unsupported input channels: {in_channels}")
        w_folded, b_folded = _fold_bn(params)
        tn, vmem_limit = _device_defaults()
        return _fused_adapter_add(w_folded, b_folded, feat, fused_accumulator,
                                  tn=tn, vmem_limit=vmem_limit)


def _reference(feat, acc, params):
    """Pure-JAX reference (eval-mode BN) for a correctness check."""
    scale = params["gamma"] / jnp.sqrt(params["var"] + BN_EPS)
    y = jnp.einsum("bchw,oc->bohw", feat, params["conv_w"]) \
        + params["conv_b"][None, :, None, None]
    y = (y - params["mean"][None, :, None, None]) * scale[None, :, None, None] \
        + params["beta"][None, :, None, None]
    y = jnp.maximum(y, 0.0)
    return acc + y


if __name__ == "__main__":
    module = SimpleHighResFusionPallas(out_channels=OUT_CHANNELS, seed=0)

    key = jax.random.PRNGKey(0)
    ks = jax.random.split(key, 6)

    B, H, W = 2, 16, 16
    feat32 = jax.random.normal(ks[0], (B, 32, H, W), jnp.float32)
    feat64 = jax.random.normal(ks[1], (B, 64, H, W), jnp.float32)
    acc_a = jax.random.normal(ks[2], (B, OUT_CHANNELS, H, W), jnp.float32)
    acc_b = jax.random.normal(ks[3], (B, OUT_CHANNELS, H, W), jnp.float32)

    # Non-128-multiple spatial extent: exercises the masked partial last tile
    # together with the aliased in-place output path.
    Hp = Wp = 30
    feat_p = jax.random.normal(ks[4], (B, 32, Hp, Wp), jnp.float32)
    acc_p = jax.random.normal(ks[5], (B, OUT_CHANNELS, Hp, Wp), jnp.float32)

    # Compute references FIRST: the acc buffers are donated to the kernel call
    # and must not be read afterwards.
    ref32 = _reference(feat32, acc_a, module.params_32)
    ref64 = _reference(feat64, acc_b, module.params_64)
    ref_p = _reference(feat_p, acc_p, module.params_32)
    ref32, ref64, ref_p = jax.block_until_ready((ref32, ref64, ref_p))

    out32 = jax.block_until_ready(module(feat32, acc_a))
    out64 = jax.block_until_ready(module(feat64, acc_b))

    # Force a small tile so the partial-tile (hw=900, TN=256) path really runs.
    w_p, b_p = _fold_bn(module.params_32)
    out_p = jax.block_until_ready(
        _fused_adapter_add(w_p, b_p, feat_p, acc_p,
                           tn=256, vmem_limit=_VMEM_LIMIT_BYTES))

    np.testing.assert_allclose(np.asarray(out32), np.asarray(ref32), rtol=1e-5, atol=1e-5)
    np.testing.assert_allclose(np.asarray(out64), np.asarray(ref64), rtol=1e-5, atol=1e-5)
    np.testing.assert_allclose(np.asarray(out_p), np.asarray(ref_p), rtol=1e-5, atol=1e-5)

    print("KERNEL_OK")
</pallas_src>

<mosaic_0001>
module attributes {stable_mosaic.version = 11 : i64} {
  func.func @_fusion_kernel(%arg0: i32, %arg1: i32, %arg2: memref<256x32xf32, #tpu.memory_space<vmem>>, %arg3: memref<256x1xf32, #tpu.memory_space<vmem>>, %arg4: memref<1x32x256xf32, #tpu.memory_space<vmem>>, %arg5: memref<1x256x256xf32, #tpu.memory_space<vmem>>, %arg6: memref<1x256x256xf32, #tpu.memory_space<vmem>>) attributes {dimension_semantics = [#tpu.dimension_semantics<parallel>, #tpu.dimension_semantics<parallel>], iteration_bounds = array<i64: 2, 1>, scalar_prefetch = 0 : i64, scratch_operands = 0 : i64, tpu.core_type = #tpu.core_type<tc>, window_params = [{pipeline_mode = #tpu.pipeline_mode<synchronous>, transform_indices = @transform_0, window_bounds = array<i64: 256, 32>}, {pipeline_mode = #tpu.pipeline_mode<synchronous>, transform_indices = @transform_1, window_bounds = array<i64: 256, 1>}, {transform_indices = @transform_2, window_bounds = array<i64: 1, 32, 256>}, {transform_indices = @transform_3, window_bounds = array<i64: 1, 256, 256>}, {transform_indices = @transform_4, window_bounds = array<i64: 1, 256, 256>}]} {
    %c0 = arith.constant 0 : index
    %c0_0 = arith.constant 0 : index
    %0 = vector.load %arg2[%c0, %c0_0] : memref<256x32xf32, #tpu.memory_space<vmem>>, vector<256x32xf32>
    %c0_1 = arith.constant 0 : index
    %c0_2 = arith.constant 0 : index
    %c0_3 = arith.constant 0 : index
    %1 = vector.load %arg4[%c0_1, %c0_2, %c0_3] : memref<1x32x256xf32, #tpu.memory_space<vmem>>, vector<1x32x256xf32>
    %2 = vector.shape_cast %1 : vector<1x32x256xf32> to vector<32x256xf32>
    %cst = arith.constant dense<0.000000e+00> : vector<256x256xf32>
    %3 = tpu.matmul %0, %2, %cst {dimension_numbers = #tpu.dot_dimension_numbers<[1], [0], [0], [1], [0, 0, 1, 1], [], []>} : vector<256x32xf32>, vector<32x256xf32>, vector<256x256xf32> -> vector<256x256xf32>
    %c0_4 = arith.constant 0 : index
    %c0_5 = arith.constant 0 : index
    %4 = vector.load %arg3[%c0_4, %c0_5] : memref<256x1xf32, #tpu.memory_space<vmem>>, vector<256x1xf32>
    %5 = vector.broadcast %4 : vector<256x1xf32> to vector<256x256xf32>
    %6 = arith.addf %3, %5 : vector<256x256xf32>
    %cst_6 = arith.constant 0.000000e+00 : f32
    %7 = vector.broadcast %cst_6 : f32 to vector<256x256xf32>
    %8 = arith.maximumf %6, %7 : vector<256x256xf32>
    %c0_7 = arith.constant 0 : index
    %c0_8 = arith.constant 0 : index
    %c0_9 = arith.constant 0 : index
    %9 = vector.load %arg5[%c0_7, %c0_8, %c0_9] : memref<1x256x256xf32, #tpu.memory_space<vmem>>, vector<1x256x256xf32>
    %10 = vector.shape_cast %9 : vector<1x256x256xf32> to vector<256x256xf32>
    %11 = arith.addf %8, %10 : vector<256x256xf32>
    %c0_10 = arith.constant 0 : index
    %c0_11 = arith.constant 0 : index
    %c0_12 = arith.constant 0 : index
    %12 = vector.load %arg6[%c0_10, %c0_11, %c0_12] : memref<1x256x256xf32, #tpu.memory_space<vmem>>, vector<1x256x256xf32>
    %13 = vector.shape_cast %12 : vector<1x256x256xf32> to vector<256x256xf32>
    %14 = vector.shape_cast %11 : vector<256x256xf32> to vector<1x256x256xf32>
    tpu.vector_store %arg6[%c0_10, %c0_11, %c0_12], %14 {strides = array<i32>} : memref<1x256x256xf32, #tpu.memory_space<vmem>>, vector<1x256x256xf32>,
    return
  }
  func.func @transform_0(%arg0: i32, %arg1: i32) -> (i32, i32) {
    %c0_i32 = arith.constant 0 : i32
    %c0_i32_0 = arith.constant 0 : i32
    %c0_i32_1 = arith.constant 0 : i32
    return %c0_i32, %c0_i32_0 : i32, i32
  }
  func.func @transform_1(%arg0: i32, %arg1: i32) -> (i32, i32) {
    %c0_i32 = arith.constant 0 : i32
    %c0_i32_0 = arith.constant 0 : i32
    %c0_i32_1 = arith.constant 0 : i32
    return %c0_i32, %c0_i32_0 : i32, i32
  }
  func.func @transform_2(%arg0: i32, %arg1: i32) -> (i32, i32, i32) {
    %c0_i32 = arith.constant 0 : i32
    %c0_i32_0 = arith.constant 0 : i32
    return %arg0, %c0_i32, %arg1 : i32, i32, i32
  }
  func.func @transform_3(%arg0: i32, %arg1: i32) -> (i32, i32, i32) {
    %c0_i32 = arith.constant 0 : i32
    %c0_i32_0 = arith.constant 0 : i32
    return %arg0, %c0_i32, %arg1 : i32, i32, i32
  }
  func.func @transform_4(%arg0: i32, %arg1: i32) -> (i32, i32, i32) {
    %c0_i32 = arith.constant 0 : i32
    %c0_i32_0 = arith.constant 0 : i32
    return %arg0, %c0_i32, %arg1 : i32, i32, i32
  }
}

</mosaic_0001>

<bundles_post_ra>
// kernel: _fused_adapter_add.1
= control target key start
LH: loop header
LB: loop body
LE: loop exit
PB: predicated region body
PF: predicated region fallthrough
CT: control target
= control target key end

     0   :  { %s1355_s15 = smov 0   ;;  %s1357_s16 = smov 0   ;;  %s2053_s0 = inlined_call_operand.vmem [shape: f32[256,32], index: 0, kind: input, shape index: {}]   ;;  %s2054_s1 = inlined_call_operand.vmem [shape: f32[256,1], index: 1, kind: input, shape index: {}]   ;;  %s2055_s2 = inlined_call_operand.vmem [shape: f32[2,32,256], index: 2, kind: input, shape index: {}]   ;;  %s2056_s3 = inlined_call_operand.vmem [shape: f32[2,256,256], index: 3, kind: input, shape index: {}, may-alias: {3,4}]   ;;  %s2057_s4 = inlined_call_operand.vmem [shape: f32[2,256,256], index: 4, kind: output, shape index: {}, may-alias: {3,4}]  }
   0x1   :  { %s1359_s17 = smov 0  }
   0x2 LB: > { %s26_s18 = sadd.s32 1, %s1322_s16  ;;  %p1224_p0 = scmp.ge.s32.totalorder %s1326_s17, 1  ;;  %s1326_s17 = sphi %s1359_s17, %s14_s17   ;;  %s1322_s16 = sphi %s1357_s16, %s2135_s16   ;;  %s1318_s15 = sphi %s1355_s15, %s2134_s15  }
   0x3   : > { %p28_p1 = scmp.ge.s32.totalorder %s26_s18, 2  ;;  %p200_p2 = scmp.lt.s32.totalorder %s1326_s17, 3 }
   0x5   : > { %s2137_s18 = smov (%p28_p1, %s26_s18), 0  ;;  %p201_p3 = pnand %p1224_p0, %p200_p2 }
   0x7   : > { %204 = sbr.rel (%p201_p3) target bundleno = 288 (0x120), region = 36 }
   0xc   : > { %p244_p4 = scmp.lt.s32.totalorder %s1318_s15, 1  ;;  %v1328_v0 = vmov 0.0   ;;  %v1329_v1 = vmov 0   ;;  %v315_v2 = vld [vmem:[%s2054_s1 + $0x10] sm:$0xff]  ;;  %v313_v3 = vld [vmem:[%s2054_s1] sm:$0xff]  ;;  %vm505_vm0 = vcmask 261120  }
   0xd   : > { %666 = vmatprep.mubr.f32.mxu0 %v1328_v0  ;;  %762 = vmatprep.mubr.f32.mxu1 %v1328_v0  ;;  %v273_v12 = vld [vmem:[%s2053_s0] sm:$0xff]  ;;  %v316_v14 = vld [vmem:[%s2054_s1 + $0x18] sm:$0xff]  ;;  %v314_v15 = vld [vmem:[%s2054_s1 + $0x8] sm:$0xff] }
   0xe   : > { %s2139_s15 = smov (!%p244_p4, %s1318_s15), 1  ;;  %1303 = vset.pattern.permute.xlu1 %v1329_v1  ;;  %1302 = vset.pattern.permute.xlu0 %v1329_v1  ;;  %v289_v13 = vld [vmem:[%s2053_s0 + $0x80] sm:$0xff]  ;;  %v274_v16 = vld [vmem:[%s2053_s0 + $0x8] sm:$0xff]  ;;  %v275_v20 = vld [vmem:[%s2053_s0 + $0x10] sm:$0xff] }
   0xf   : > { %357 = vperm.xlu1 %1303, %v315_v2   ;;  %347 = vperm.xlu0 %1302, %v313_v3   ;;  %s1265_s23 = sshll.u32 %s2139_s15, 6  ;;  %v290_v17 = vld [vmem:[%s2053_s0 + $0x88] sm:$0xff]  ;;  %v317_v19 = vld [vmem:[%s2054_s1 + $0x20] sm:$0xff]  ;;  %v291_v21 = vld [vmem:[%s2053_s0 + $0x90] sm:$0xff]  ;;  %s1266_s19 = sshll.u32 %s2139_s15, 9 }
  0x10   : > { %s251_s26 = scalar_lea.vmem %s2055_s2, %s1265_s23  ;;  %v318_v18 = vld [vmem:[%s2054_s1 + $0x28] sm:$0xff]  ;;  %v320_v22 = vld [vmem:[%s2054_s1 + $0x38] sm:$0xff]  ;;  %v319_v23 = vld [vmem:[%s2054_s1 + $0x30] sm:$0xff]  ;;  %s1671_s22 = scalar_lea.vmem %s2056_s3, %s1266_s19 }
  0x11   : > { %v312_v4 = vld [vmem:[%s251_s26 + $0x38] sm:$0xff]  ;;  %v311_v5 = vld [vmem:[%s251_s26 + $0x30] sm:$0xff]  ;;  %v310_v6 = vld [vmem:[%s251_s26 + $0x28] sm:$0xff]  ;;  %s1875_s25 = scalar_lea.vmem %s2057_s4, %s1266_s19 }
  0x12   : > { %626 = vmatprep.subr.mxu0 %v312_v4  ;;  %1268 = vmatprep.subr.mxu1 %v312_v4  ;;  %v309_v7 = vld [vmem:[%s251_s26 + $0x20] sm:$0xff]  ;;  %v308_v8 = vld [vmem:[%s251_s26 + $0x18] sm:$0xff]  ;;  %v307_v9 = vld [vmem:[%s251_s26 + $0x10] sm:$0xff] }
  0x13   : > { %627 = vmatpush1.msra.mxu0 %v311_v5  ;;  %1272 = vmatpush1.msra.mxu1 %v311_v5  ;;  %v306_v10 = vld [vmem:[%s251_s26 + $0x8] sm:$0xff]  ;;  %v305_v11 = vld [vmem:[%s251_s26] sm:$0xff]  ;;  %v276_v24 = vld [vmem:[%s2053_s0 + $0x18] sm:$0xff] }
  0x14   : > { %628 = vmatprep.subr.mxu0 %v310_v6  ;;  %1269 = vmatprep.subr.mxu1 %v310_v6  ;;  %v292_v25 = vld [vmem:[%s2053_s0 + $0x98] sm:$0xff]  ;;  %v322_v26 = vld [vmem:[%s2054_s1 + $0x48] sm:$0xff]  ;;  %v321_v27 = vld [vmem:[%s2054_s1 + $0x40] sm:$0xff] }
  0x15   : > { %629 = vmatpush1.msra.mxu0 %v309_v7  ;;  %1273 = vmatpush1.msra.mxu1 %v309_v7  ;;  %v277_v28 = vld [vmem:[%s2053_s0 + $0x20] sm:$0xff]  ;;  %v324_v30 = vld [vmem:[%s2054_s1 + $0x58] sm:$0xff]  ;;  %v323_v31 = vld [vmem:[%s2054_s1 + $0x50] sm:$0xff] }
  0x16   : > { %630 = vmatprep.subr.mxu0 %v308_v8  ;;  %1270 = vmatprep.subr.mxu1 %v308_v8  ;;  %v293_v29 = vld [vmem:[%s2053_s0 + $0xa0] sm:$0xff]  ;;  %v278_v32 = vld [vmem:[%s2053_s0 + $0x28] sm:$0xff]  ;;  %v279_v36 = vld [vmem:[%s2053_s0 + $0x30] sm:$0xff] }
  0x17   : > { %631 = vmatpush1.msra.mxu0 %v307_v9  ;;  %1274 = vmatpush1.msra.mxu1 %v307_v9  ;;  %v294_v33 = vld [vmem:[%s2053_s0 + $0xa8] sm:$0xff]  ;;  %v325_v35 = vld [vmem:[%s2054_s1 + $0x60] sm:$0xff]  ;;  %v295_v37 = vld [vmem:[%s2053_s0 + $0xb0] sm:$0xff] }
  0x18   : > { %632 = vmatprep.subr.mxu0 %v306_v10  ;;  %1271 = vmatprep.subr.mxu1 %v306_v10  ;;  %v326_v34 = vld [vmem:[%s2054_s1 + $0x68] sm:$0xff]  ;;  %v328_v38 = vld [vmem:[%s2054_s1 + $0x78] sm:$0xff]  ;;  %v327_v39 = vld [vmem:[%s2054_s1 + $0x70] sm:$0xff] }
  0x19   : > { %633 = vmatpush1.msra.mxu0 %v305_v11  ;;  %1275 = vmatpush1.msra.mxu1 %v305_v11  ;;  %v280_v40 = vld [vmem:[%s2053_s0 + $0x38] sm:$0xff]  ;;  %v330_v42 = vld [vmem:[%s2054_s1 + $0x88] sm:$0xff]  ;;  %v329_v43 = vld [vmem:[%s2054_s1 + $0x80] sm:$0xff] }
  0x1a   : > { %1231 = vmatmul.mubr.msk.f32.vlgmr.msra.gmra.mxu0 %vm505_vm0, %v273_v12  ;;  %1247 = vmatmul.mubr.msk.f32.vlgmr.msra.gmra.mxu1 %vm505_vm0, %v289_v13  ;;  %v296_v41 = vld [vmem:[%s2053_s0 + $0xb8] sm:$0xff]  ;;  %v281_v44 = vld [vmem:[%s2053_s0 + $0x40] sm:$0xff]  ;;  %v331_v47 = vld [vmem:[%s2054_s1 + $0x90] sm:$0xff] }
  0x1b   : > { %672 = vmatprep.mubr.f32.mxu0 %v1328_v0  ;;  %768 = vmatprep.mubr.f32.mxu1 %v1328_v0  ;;  %v297_v45 = vld [vmem:[%s2053_s0 + $0xc0] sm:$0xff]  ;;  %v332_v46 = vld [vmem:[%s2054_s1 + $0x98] sm:$0xff]  ;;  %v282_v48 = vld [vmem:[%s2053_s0 + $0x48] sm:$0xff] }
  0x1c   : > { %362 = vperm.xlu1 %1303, %v316_v14   ;;  %352 = vperm.xlu0 %1302, %v314_v15   ;;  %v298_v49 = vld [vmem:[%s2053_s0 + $0xc8] sm:$0xff]  ;;  %v333_v51 = vld [vmem:[%s2054_s1 + $0xa0] sm:$0xff]  ;;  %v283_v52 = vld [vmem:[%s2053_s0 + $0x50] sm:$0xff] }
  0x1d   : > { %v334_v50 = vld [vmem:[%s2054_s1 + $0xa8] sm:$0xff]  ;;  %v299_v53 = vld [vmem:[%s2053_s0 + $0xd0] sm:$0xff]  ;;  %v336_v54 = vld [vmem:[%s2054_s1 + $0xb8] sm:$0xff] }
  0x1e   : > { %1232 = vmatmul.mubr.msk.f32.gmra.mxu0 %vm505_vm0, %v274_v16  ;;  %1248 = vmatmul.mubr.msk.f32.gmra.mxu1 %vm505_vm0, %v290_v17  ;;  %v335_v55 = vld [vmem:[%s2054_s1 + $0xb0] sm:$0xff]  ;;  %v284_v56 = vld [vmem:[%s2053_s0 + $0x58] sm:$0xff]  ;;  %v338_v58 = vld [vmem:[%s2054_s1 + $0xc8] sm:$0xff] }
  0x1f   : > { %678 = vmatprep.mubr.f32.mxu0 %v1328_v0  ;;  %774 = vmatprep.mubr.f32.mxu1 %v1328_v0  ;;  %v300_v57 = vld [vmem:[%s2053_s0 + $0xd8] sm:$0xff]  ;;  %v337_v59 = vld [vmem:[%s2054_s1 + $0xc0] sm:$0xff]  ;;  %v339_v63 = vld [vmem:[%s2054_s1 + $0xd0] sm:$0xff] }
  0x20   : > { %372 = vperm.xlu1 %1303, %v318_v18   ;;  %367 = vperm.xlu0 %1302, %v317_v19   ;;  %v285_v60 = vld [vmem:[%s2053_s0 + $0x60] sm:$0xff]  ;;  %v340_v62 = vld [vmem:[%s2054_s1 + $0xd8] sm:$0xff]  ;;  %v286_v1 = vld [vmem:[%s2053_s0 + $0x68] sm:$0xff] }
  0x21   : > { %v301_v61 = vld [vmem:[%s2053_s0 + $0xe0] sm:$0xff]  ;;  %v302_v2 = vld [vmem:[%s2053_s0 + $0xe8] sm:$0xff]  ;;  %v287_v5 = vld [vmem:[%s2053_s0 + $0x70] sm:$0xff] }
  0x22   : > { %1233 = vmatmul.mubr.msk.f32.gmra.mxu0 %vm505_vm0, %v275_v20  ;;  %1249 = vmatmul.mubr.msk.f32.gmra.mxu1 %vm505_vm0, %v291_v21  ;;  %v342_v3 = vld [vmem:[%s2054_s1 + $0xe8] sm:$0xff]  ;;  %v341_v4 = vld [vmem:[%s2054_s1 + $0xe0] sm:$0xff]  ;;  %v303_v6 = vld [vmem:[%s2053_s0 + $0xf0] sm:$0xff] }
  0x23   : > { %684 = vmatprep.mubr.f32.mxu0 %v1328_v0  ;;  %780 = vmatprep.mubr.f32.mxu1 %v1328_v0  ;;  %v344_v7 = vld [vmem:[%s2054_s1 + $0xf8] sm:$0xff]  ;;  %v343_v8 = vld [vmem:[%s2054_s1 + $0xf0] sm:$0xff] }
  0x24   : > { %382 = vperm.xlu1 %1303, %v320_v22   ;;  %377 = vperm.xlu0 %1302, %v319_v23   ;;  %v288_v9 = vld [vmem:[%s2053_s0 + $0x78] sm:$0xff] }
  0x25   : > { %v304_v10 = vld [vmem:[%s2053_s0 + $0xf8] sm:$0xff] }
  0x26   : > { %1234 = vmatmul.mubr.msk.f32.gmra.mxu0 %vm505_vm0, %v276_v24  ;;  %1250 = vmatmul.mubr.msk.f32.gmra.mxu1 %vm505_vm0, %v292_v25 }
  0x27   : > { %690 = vmatprep.mubr.f32.mxu0 %v1328_v0  ;;  %786 = vmatprep.mubr.f32.mxu1 %v1328_v0 }
  0x28   : > { %392 = vperm.xlu1 %1303, %v322_v26   ;;  %387 = vperm.xlu0 %1302, %v321_v27  }
  0x2a   : > { %1235 = vmatmul.mubr.msk.f32.gmra.mxu0 %vm505_vm0, %v277_v28  ;;  %1251 = vmatmul.mubr.msk.f32.gmra.mxu1 %vm505_vm0, %v293_v29 }
  0x2b   : > { %696 = vmatprep.mubr.f32.mxu0 %v1328_v0  ;;  %792 = vmatprep.mubr.f32.mxu1 %v1328_v0 }
  0x2c   : > { %402 = vperm.xlu1 %1303, %v324_v30   ;;  %397 = vperm.xlu0 %1302, %v323_v31   ;;  %v1681_v30 = vld [vmem:[%s1671_s22] sm:$0xff] }
  0x2e   : > { %1236 = vmatmul.mubr.msk.f32.gmra.mxu0 %vm505_vm0, %v278_v32  ;;  %1252 = vmatmul.mubr.msk.f32.gmra.mxu1 %vm505_vm0, %v294_v33  ;;  %v1687_v32 = vld [vmem:[%s1671_s22 + $0x100] sm:$0xff] }
  0x2f   : > { %702 = vmatprep.mubr.f32.mxu0 %v1328_v0  ;;  %798 = vmatprep.mubr.f32.mxu1 %v1328_v0 }
  0x30   : > { %412 = vperm.xlu1 %1303, %v326_v34   ;;  %407 = vperm.xlu0 %1302, %v325_v35   ;;  %v1690_v34 = vld [vmem:[%s1671_s22 + $0x8] sm:$0xff] }
  0x32   : > { %1237 = vmatmul.mubr.msk.f32.gmra.mxu0 %vm505_vm0, %v279_v36  ;;  %1253 = vmatmul.mubr.msk.f32.gmra.mxu1 %vm505_vm0, %v295_v37  ;;  %v1693_v36 = vld [vmem:[%s1671_s22 + $0x108] sm:$0xff]  ;;  %v1696_v37 = vld [vmem:[%s1671_s22 + $0x10] sm:$0xff] }
  0x33   : > { %708 = vmatprep.mubr.f32.mxu0 %v1328_v0  ;;  %804 = vmatprep.mubr.f32.mxu1 %v1328_v0 }
  0x34   : > { %422 = vperm.xlu1 %1303, %v328_v38   ;;  %417 = vperm.xlu0 %1302, %v327_v39   ;;  %v1699_v38 = vld [vmem:[%s1671_s22 + $0x110] sm:$0xff]  ;;  %v1702_v39 = vld [vmem:[%s1671_s22 + $0x18] sm:$0xff] }
  0x36   : > { %1238 = vmatmul.mubr.msk.f32.gmra.mxu0 %vm505_vm0, %v280_v40  ;;  %1254 = vmatmul.mubr.msk.f32.gmra.mxu1 %vm505_vm0, %v296_v41  ;;  %v1705_v40 = vld [vmem:[%s1671_s22 + $0x118] sm:$0xff]  ;;  %v1708_v41 = vld [vmem:[%s1671_s22 + $0x20] sm:$0xff] }
  0x37   : > { %714 = vmatprep.mubr.f32.mxu0 %v1328_v0  ;;  %810 = vmatprep.mubr.f32.mxu1 %v1328_v0 }
  0x38   : > { %432 = vperm.xlu1 %1303, %v330_v42   ;;  %427 = vperm.xlu0 %1302, %v329_v43   ;;  %v1711_v42 = vld [vmem:[%s1671_s22 + $0x120] sm:$0xff]  ;;  %v1714_v43 = vld [vmem:[%s1671_s22 + $0x28] sm:$0xff] }
  0x3a   : > { %1239 = vmatmul.mubr.msk.f32.gmra.mxu0 %vm505_vm0, %v281_v44  ;;  %1255 = vmatmul.mubr.msk.f32.gmra.mxu1 %vm505_vm0, %v297_v45  ;;  %v1717_v44 = vld [vmem:[%s1671_s22 + $0x128] sm:$0xff]  ;;  %v1720_v45 = vld [vmem:[%s1671_s22 + $0x30] sm:$0xff] }
  0x3b   : > { %720 = vmatprep.mubr.f32.mxu0 %v1328_v0  ;;  %816 = vmatprep.mubr.f32.mxu1 %v1328_v0 }
  0x3c   : > { %442 = vperm.xlu1 %1303, %v332_v46   ;;  %437 = vperm.xlu0 %1302, %v331_v47   ;;  %v1723_v46 = vld [vmem:[%s1671_s22 + $0x130] sm:$0xff]  ;;  %v1726_v47 = vld [vmem:[%s1671_s22 + $0x38] sm:$0xff] }
  0x3e   : > { %1240 = vmatmul.mubr.msk.f32.gmra.mxu0 %vm505_vm0, %v282_v48  ;;  %1256 = vmatmul.mubr.msk.f32.gmra.mxu1 %vm505_vm0, %v298_v49  ;;  %v1729_v48 = vld [vmem:[%s1671_s22 + $0x138] sm:$0xff]  ;;  %v1732_v49 = vld [vmem:[%s1671_s22 + $0x40] sm:$0xff] }
  0x3f   : > { %726 = vmatprep.mubr.f32.mxu0 %v1328_v0  ;;  %822 = vmatprep.mubr.f32.mxu1 %v1328_v0 }
  0x40   : > { %452 = vperm.xlu1 %1303, %v334_v50   ;;  %447 = vperm.xlu0 %1302, %v333_v51   ;;  %v1735_v50 = vld [vmem:[%s1671_s22 + $0x140] sm:$0xff]  ;;  %v1738_v51 = vld [vmem:[%s1671_s22 + $0x48] sm:$0xff] }
  0x42   : > { %1241 = vmatmul.mubr.msk.f32.gmra.mxu0 %vm505_vm0, %v283_v52  ;;  %1257 = vmatmul.mubr.msk.f32.gmra.mxu1 %vm505_vm0, %v299_v53  ;;  %v1741_v52 = vld [vmem:[%s1671_s22 + $0x148] sm:$0xff]  ;;  %v1744_v53 = vld [vmem:[%s1671_s22 + $0x50] sm:$0xff] }
  0x43   : > { %732 = vmatprep.mubr.f32.mxu0 %v1328_v0  ;;  %828 = vmatprep.mubr.f32.mxu1 %v1328_v0 }
  0x44   : > { %462 = vperm.xlu1 %1303, %v336_v54   ;;  %457 = vperm.xlu0 %1302, %v335_v55   ;;  %v1747_v54 = vld [vmem:[%s1671_s22 + $0x150] sm:$0xff]  ;;  %v1750_v55 = vld [vmem:[%s1671_s22 + $0x58] sm:$0xff] }
  0x46   : > { %1242 = vmatmul.mubr.msk.f32.gmra.mxu0 %vm505_vm0, %v284_v56  ;;  %1258 = vmatmul.mubr.msk.f32.gmra.mxu1 %vm505_vm0, %v300_v57  ;;  %v1753_v56 = vld [vmem:[%s1671_s22 + $0x158] sm:$0xff]  ;;  %v1756_v57 = vld [vmem:[%s1671_s22 + $0x60] sm:$0xff] }
  0x47   : > { %738 = vmatprep.mubr.f32.mxu0 %v1328_v0  ;;  %834 = vmatprep.mubr.f32.mxu1 %v1328_v0 }
  0x48   : > { %472 = vperm.xlu1 %1303, %v338_v58   ;;  %467 = vperm.xlu0 %1302, %v337_v59   ;;  %v1759_v58 = vld [vmem:[%s1671_s22 + $0x160] sm:$0xff]  ;;  %v1762_v59 = vld [vmem:[%s1671_s22 + $0x68] sm:$0xff] }
  0x4a   : > { %1243 = vmatmul.mubr.msk.f32.gmra.mxu0 %vm505_vm0, %v285_v60  ;;  %1259 = vmatmul.mubr.msk.f32.gmra.mxu1 %vm505_vm0, %v301_v61  ;;  %v1765_v60 = vld [vmem:[%s1671_s22 + $0x168] sm:$0xff]  ;;  %v1768_v61 = vld [vmem:[%s1671_s22 + $0x70] sm:$0xff] }
  0x4b   : > { %744 = vmatprep.mubr.f32.mxu0 %v1328_v0  ;;  %840 = vmatprep.mubr.f32.mxu1 %v1328_v0 }
  0x4c   : > { %482 = vperm.xlu1 %1303, %v340_v62   ;;  %477 = vperm.xlu0 %1302, %v339_v63   ;;  %v1771_v62 = vld [vmem:[%s1671_s22 + $0x170] sm:$0xff]  ;;  %v1774_v63 = vld [vmem:[%s1671_s22 + $0x78] sm:$0xff] }
  0x4e   : > { %1244 = vmatmul.mubr.msk.f32.gmra.mxu0 %vm505_vm0, %v286_v1  ;;  %1260 = vmatmul.mubr.msk.f32.gmra.mxu1 %vm505_vm0, %v302_v2  ;;  %v1777_v1 = vld [vmem:[%s1671_s22 + $0x178] sm:$0xff]  ;;  %v1780_v2 = vld [vmem:[%s1671_s22 + $0x80] sm:$0xff] }
  0x4f   : > { %750 = vmatprep.mubr.f32.mxu0 %v1328_v0  ;;  %846 = vmatprep.mubr.f32.mxu1 %v1328_v0 }
  0x50   : > { %492 = vperm.xlu1 %1303, %v342_v3   ;;  %487 = vperm.xlu0 %1302, %v341_v4   ;;  %v1783_v3 = vld [vmem:[%s1671_s22 + $0x180] sm:$0xff]  ;;  %v1786_v4 = vld [vmem:[%s1671_s22 + $0x88] sm:$0xff] }
  0x52   : > { %1245 = vmatmul.mubr.msk.f32.gmra.mxu0 %vm505_vm0, %v287_v5  ;;  %1261 = vmatmul.mubr.msk.f32.gmra.mxu1 %vm505_vm0, %v303_v6  ;;  %v1789_v5 = vld [vmem:[%s1671_s22 + $0x188] sm:$0xff]  ;;  %v1792_v6 = vld [vmem:[%s1671_s22 + $0x90] sm:$0xff] }
  0x53   : > { %756 = vmatprep.mubr.f32.mxu0 %v1328_v0  ;;  %852 = vmatprep.mubr.f32.mxu1 %v1328_v0  ;;  %2070 = vst [vmem:[#allocation8_spill] sm:$0xff] %v1789_v5  ;;  %2071 = vst [vmem:[#allocation9_spill] sm:$0xff] %v1792_v6 }
  0x54   : > { %502 = vperm.xlu1 %1303, %v344_v7   ;;  %497 = vperm.xlu0 %1302, %v343_v8   ;;  %v1795_v7 = vld [vmem:[%s1671_s22 + $0x190] sm:$0xff]  ;;  %v1798_v8 = vld [vmem:[%s1671_s22 + $0x98] sm:$0xff] }
  0x55   : > { %2072 = vst [vmem:[#allocation10_spill] sm:$0xff] %v1795_v7  ;;  %2073 = vst [vmem:[#allocation11_spill] sm:$0xff] %v1798_v8  ;;  %v1862_v8 = vld [vmem:[%s1671_s22 + $0xe8] sm:$0xff] }
  0x56   : > { %1246 = vmatmul.mubr.msk.f32.gmra.mxu0 %vm505_vm0, %v288_v9  ;;  %1262 = vmatmul.mubr.msk.f32.gmra.mxu1 %vm505_vm0, %v304_v10  ;;  %v1801_v9 = vld [vmem:[%s1671_s22 + $0x198] sm:$0xff]  ;;  %v1804_v10 = vld [vmem:[%s1671_s22 + $0xa0] sm:$0xff]  ;;  %2093 = vst [vmem:[#allocation31_spill] sm:$0xff] %v1862_v8 }
  0x57   : > { %2074 = vst [vmem:[#allocation12_spill] sm:$0xff] %v1801_v9  ;;  %2075 = vst [vmem:[#allocation13_spill] sm:$0xff] %v1804_v10  ;;  %v1828_v9 = vld [vmem:[%s1671_s22 + $0xc0] sm:$0xff] }
  0x58   : > { %2083 = vst [vmem:[#allocation21_spill] sm:$0xff] %v1828_v9  ;;  %v1831_v10 = vld [vmem:[%s1671_s22 + $0x1c0] sm:$0xff] }
  0x59   : > { %2084 = vst [vmem:[#allocation22_spill] sm:$0xff] %v1831_v10  ;;  %v1852_v9 = vld [vmem:[%s1671_s22 + $0xe0] sm:$0xff] }
  0x5a   : > { %2091 = vst [vmem:[#allocation29_spill] sm:$0xff] %v1852_v9  ;;  %v1878_v9 = vld [vmem:[%s1671_s22 + $0x1f0] sm:$0xff] }
  0x5b   : > { %2096 = vst [vmem:[#allocation34_spill] sm:$0xff] %v1878_v9 }
  0x8a   : > { %v1635_v11 = vpop.permute.xlu0 %347  ;;  %v1637_v12 = vpop.permute.xlu1 %357 }
  0x97   : > { %v1639_v0 = vpop.permute.xlu0 %352  ;;  %v1641_v13 = vpop.permute.xlu1 %362 }
  0x9b   : > { %v1643_v14 = vpop.permute.xlu0 %367  ;;  %v1645_v15 = vpop.permute.xlu1 %372 }
  0x9f   : > { %v1647_v16 = vpop.permute.xlu0 %377  ;;  %v1649_v17 = vpop.permute.xlu1 %382 }
  0xa3   : > { %v1651_v18 = vpop.permute.xlu0 %387  ;;  %v1653_v19 = vpop.permute.xlu1 %392 }
  0xa7   : > { %v1655_v20 = vpop.permute.xlu0 %397  ;;  %v1657_v21 = vpop.permute.xlu1 %402 }
  0xa8   : > { %2064 = vst [vmem:[#allocation2_spill] sm:$0xff] %v1655_v20  ;;  %2065 = vst [vmem:[#allocation3_spill] sm:$0xff] %v1657_v21  ;;  %v1825_v21 = vld [vmem:[%s1671_s22 + $0x1b8] sm:$0xff] }
  0xa9   : > { %2082 = vst [vmem:[#allocation20_spill] sm:$0xff] %v1825_v21  ;;  %v1849_v21 = vld [vmem:[%s1671_s22 + $0x1d8] sm:$0xff] }
  0xaa   : > { %2090 = vst [vmem:[#allocation28_spill] sm:$0xff] %v1849_v21 }
  0xab   : > { %v1659_v22 = vpop.permute.xlu0 %407  ;;  %v1661_v23 = vpop.permute.xlu1 %412 }
  0xac   : > { %2066 = vst [vmem:[#allocation4_spill] sm:$0xff] %v1659_v22  ;;  %2067 = vst [vmem:[#allocation5_spill] sm:$0xff] %v1661_v23  ;;  %v1819_v23 = vld [vmem:[%s1671_s22 + $0x1b0] sm:$0xff]  ;;  %v1822_v22 = vld [vmem:[%s1671_s22 + $0xb8] sm:$0xff] }
  0xad   : > { %2080 = vst [vmem:[#allocation18_spill] sm:$0xff] %v1819_v23  ;;  %2081 = vst [vmem:[#allocation19_spill] sm:$0xff] %v1822_v22  ;;  %v1843_v23 = vld [vmem:[%s1671_s22 + $0x1d0] sm:$0xff]  ;;  %v1846_v22 = vld [vmem:[%s1671_s22 + $0xd8] sm:$0xff] }
  0xae   : > { %2088 = vst [vmem:[#allocation26_spill] sm:$0xff] %v1843_v23  ;;  %2089 = vst [vmem:[#allocation27_spill] sm:$0xff] %v1846_v22  ;;  %v1865_v23 = vld [vmem:[%s1671_s22 + $0x1e8] sm:$0xff]  ;;  %v1868_v22 = vld [vmem:[%s1671_s22 + $0xf0] sm:$0xff] }
  0xaf   : > { %v1663_v24 = vpop.permute.xlu0 %417  ;;  %v1673_v25 = vpop.permute.xlu1 %422  ;;  %2094 = vst [vmem:[#allocation32_spill] sm:$0xff] %v1865_v23  ;;  %2095 = vst [vmem:[#allocation33_spill] sm:$0xff] %v1868_v22 }
  0xb0   : > { %2068 = vst [vmem:[#allocation6_spill] sm:$0xff] %v1663_v24  ;;  %2069 = vst [vmem:[#allocation7_spill] sm:$0xff] %v1673_v25  ;;  %v1813_v25 = vld [vmem:[%s1671_s22 + $0x1a8] sm:$0xff]  ;;  %v1816_v24 = vld [vmem:[%s1671_s22 + $0xb0] sm:$0xff] }
  0xb1   : > { %2078 = vst [vmem:[#allocation16_spill] sm:$0xff] %v1813_v25  ;;  %2079 = vst [vmem:[#allocation17_spill] sm:$0xff] %v1816_v24  ;;  %v1840_v25 = vld [vmem:[%s1671_s22 + $0xd0] sm:$0xff]  ;;  %v1855_v24 = vld [vmem:[%s1671_s22 + $0x1e0] sm:$0xff] }
  0xb2   : > { %2087 = vst [vmem:[#allocation25_spill] sm:$0xff] %v1840_v25  ;;  %2092 = vst [vmem:[#allocation30_spill] sm:$0xff] %v1855_v24 }
  0xb3   : > { %v1675_v26 = vpop.permute.xlu0 %427 }
  0xb7   : > { %v438_v9 = vpop.permute.xlu0 %437 }
  0xda   : > { %v668_v27 = vpop.f32.mrf.mxu0  ;;  %v764_v28 = vpop.f32.mrf.mxu1 }
  0xdb   : > { %v1678_v29 = vadd.f32 %v668_v27, %v1635_v11  ;;  %v1684_v31 = vadd.f32 %v764_v28, %v1675_v26  ;;  %v1807_v27 = vld [vmem:[%s1671_s22 + $0x1a0] sm:$0xff]  ;;  %v1810_v28 = vld [vmem:[%s1671_s22 + $0xa8] sm:$0xff] }
  0xdc   : > { %v670_v33 = vpop.f32.mrf.mxu0  ;;  %v766_v35 = vpop.f32.mrf.mxu1  ;;  %2076 = vst [vmem:[#allocation14_spill] sm:$0xff] %v1807_v27  ;;  %2077 = vst [vmem:[#allocation15_spill] sm:$0xff] %v1810_v28  ;;  %v1834_v27 = vld [vmem:[%s1671_s22 + $0xc8] sm:$0xff] }
  0xdd   : > { %2085 = vst [vmem:[#allocation23_spill] sm:$0xff] %v1834_v27  ;;  %v1837_v28 = vld [vmem:[%s1671_s22 + $0x1c8] sm:$0xff]  ;;  %v859_v10 = vmax.f32 %v1678_v29, 0.0  ;;  %v891_v27 = vmax.f32 %v1684_v31, 0.0  ;;  %v767_v25 = vadd.f32 %v766_v35, %v1675_v26  ;;  %v1881_v31 = vld [vmem:[%s1671_s22 + $0xf8] sm:$0xff]  ;;  %v433_v26 = vpop.permute.xlu1 %432 }
  0xde   : > { %2086 = vst [vmem:[#allocation24_spill] sm:$0xff] %v1837_v28  ;;  %v671_v28 = vadd.f32 %v670_v33, %v1635_v11  ;;  %v674_v24 = vpop.f32.mrf.mxu0  ;;  %v770_v29 = vpop.f32.mrf.mxu1  ;;  %2097 = vst [vmem:[#allocation35_spill] sm:$0xff] %v1881_v31  ;;  %v1884_v11 = vld [vmem:[%s1671_s22 + $0x1f8] sm:$0xff] }
  0xdf   : > { %2098 = vst [vmem:[#allocation36_spill] sm:$0xff] %v1884_v11  ;;  %v987_v33 = vadd.f32 %v1681_v30, %v859_v10  ;;  %v1019_v35 = vadd.f32 %v1687_v32, %v891_v27  ;;  %v892_v23 = vmax.f32 %v767_v25, 0.0  ;;  %v675_v8 = vadd.f32 %v674_v24, %v1639_v0 }
  0xe0   : > { %v860_v22 = vmax.f32 %v671_v28, 0.0  ;;  %v771_v21 = vadd.f32 %v770_v29, %v433_v26  ;;  %v676_v20 = vpop.f32.mrf.mxu0  ;;  %v772_v7 = vpop.f32.mrf.mxu1 }
  0xe1   : > { %v1020_v11 = vadd.f32 %v1693_v36, %v892_v23  ;;  %v677_v6 = vadd.f32 %v676_v20, %v1639_v0  ;;  %v773_v5 = vadd.f32 %v772_v7, %v433_v26  ;;  %1051 = vst [vmem:[%s1875_s25] sm:$0xff] %v987_v33  ;;  %1083 = vst [vmem:[%s1875_s25 + $0x100] sm:$0xff] %v1019_v35  ;;  %v861_v30 = vmax.f32 %v675_v8, 0.0 }
  0xe2   : > { %v988_v31 = vadd.f32 %v1690_v34, %v860_v22  ;;  %v893_v32 = vmax.f32 %v771_v21, 0.0  ;;  %v680_v25 = vpop.f32.mrf.mxu0  ;;  %v776_v10 = vpop.f32.mrf.mxu1 }
  0xe3   : > { %v862_v24 = vmax.f32 %v677_v6, 0.0  ;;  %v894_v27 = vmax.f32 %v773_v5, 0.0  ;;  %v681_v28 = vadd.f32 %v680_v25, %v1637_v12  ;;  %v777_v29 = vadd.f32 %v776_v10, %v438_v9  ;;  %1084 = vst [vmem:[%s1875_s25 + $0x108] sm:$0xff] %v1020_v11  ;;  %v443_v34 = vpop.permute.xlu1 %442 }
  0xe4   : > { %1052 = vst [vmem:[%s1875_s25 + $0x8] sm:$0xff] %v988_v31  ;;  %v989_v22 = vadd.f32 %v1696_v37, %v861_v30  ;;  %v1021_v0 = vadd.f32 %v1699_v38, %v893_v32  ;;  %v682_v20 = vpop.f32.mrf.mxu0  ;;  %v778_v23 = vpop.f32.mrf.mxu1 }
  0xe5   : > { %v990_v21 = vadd.f32 %v1702_v39, %v862_v24  ;;  %v1022_v36 = vadd.f32 %v1705_v40, %v894_v27  ;;  %v863_v5 = vmax.f32 %v681_v28, 0.0  ;;  %v895_v6 = vmax.f32 %v777_v29, 0.0  ;;  %v448_v27 = vpop.permute.xlu0 %447 }
  0xe6   : > { %v683_v7 = vadd.f32 %v682_v20, %v1637_v12  ;;  %v779_v8 = vadd.f32 %v778_v23, %v438_v9  ;;  %v686_v31 = vpop.f32.mrf.mxu0  ;;  %v782_v11 = vpop.f32.mrf.mxu1  ;;  %1053 = vst [vmem:[%s1875_s25 + $0x10] sm:$0xff] %v989_v22  ;;  %1085 = vst [vmem:[%s1875_s25 + $0x110] sm:$0xff] %v1021_v0 }
  0xe7   : > { %v991_v37 = vadd.f32 %v1708_v41, %v863_v5  ;;  %v1023_v38 = vadd.f32 %v1711_v42, %v895_v6  ;;  %v687_v26 = vadd.f32 %v686_v31, %v1641_v13  ;;  %v783_v39 = vadd.f32 %v782_v11, %v443_v34  ;;  %1054 = vst [vmem:[%s1875_s25 + $0x18] sm:$0xff] %v990_v21 }
  0xe8   : > { %1086 = vst [vmem:[%s1875_s25 + $0x118] sm:$0xff] %v1022_v36  ;;  %v864_v40 = vmax.f32 %v683_v7, 0.0  ;;  %v896_v33 = vmax.f32 %v779_v8, 0.0  ;;  %v688_v35 = vpop.f32.mrf.mxu0  ;;  %v784_v12 = vpop.f32.mrf.mxu1 }
  0xe9   : > { %v865_v9 = vmax.f32 %v687_v26, 0.0  ;;  %v897_v30 = vmax.f32 %v783_v39, 0.0  ;;  %v689_v32 = vadd.f32 %v688_v35, %v1641_v13  ;;  %v785_v25 = vadd.f32 %v784_v12, %v443_v34  ;;  %1055 = vst [vmem:[%s1875_s25 + $0x20] sm:$0xff] %v991_v37  ;;  %1087 = vst [vmem:[%s1875_s25 + $0x120] sm:$0xff] %v1023_v38  ;;  %v458_v26 = vpop.permute.xlu0 %457 }
  0xea   : > { %v992_v41 = vadd.f32 %v1714_v43, %v864_v40  ;;  %v1024_v42 = vadd.f32 %v1717_v44, %v896_v33  ;;  %v692_v10 = vpop.f32.mrf.mxu0  ;;  %v788_v24 = vpop.f32.mrf.mxu1 }
  0xeb   : > { %v993_v28 = vadd.f32 %v1720_v45, %v865_v9  ;;  %v1025_v29 = vadd.f32 %v1723_v46, %v897_v30  ;;  %v866_v22 = vmax.f32 %v689_v32, 0.0  ;;  %v898_v13 = vmax.f32 %v785_v25, 0.0  ;;  %v453_v43 = vpop.permute.xlu1 %452 }
  0xec   : > { %v693_v0 = vadd.f32 %v692_v10, %v1643_v14  ;;  %v789_v20 = vadd.f32 %v788_v24, %v448_v27  ;;  %v694_v23 = vpop.f32.mrf.mxu0  ;;  %v790_v34 = vpop.f32.mrf.mxu1  ;;  %1056 = vst [vmem:[%s1875_s25 + $0x28] sm:$0xff] %v992_v41  ;;  %1088 = vst [vmem:[%s1875_s25 + $0x128] sm:$0xff] %v1024_v42 }
  0xed   : > { %v994_v44 = vadd.f32 %v1726_v47, %v866_v22  ;;  %v1026_v21 = vadd.f32 %v1729_v48, %v898_v13  ;;  %v695_v45 = vadd.f32 %v694_v23, %v1643_v14  ;;  %v791_v36 = vadd.f32 %v790_v34, %v448_v27  ;;  %1057 = vst [vmem:[%s1875_s25 + $0x30] sm:$0xff] %v993_v28 }
  0xee   : > { %1089 = vst [vmem:[%s1875_s25 + $0x130] sm:$0xff] %v1025_v29  ;;  %v867_v46 = vmax.f32 %v693_v0, 0.0  ;;  %v899_v5 = vmax.f32 %v789_v20, 0.0  ;;  %v698_v6 = vpop.f32.mrf.mxu0  ;;  %v794_v7 = vpop.f32.mrf.mxu1 }
  0xef   : > { %v868_v8 = vmax.f32 %v695_v45, 0.0  ;;  %v900_v31 = vmax.f32 %v791_v36, 0.0  ;;  %v699_v11 = vadd.f32 %v698_v6, %v1645_v15  ;;  %v795_v37 = vadd.f32 %v794_v7, %v453_v43  ;;  %1058 = vst [vmem:[%s1875_s25 + $0x38] sm:$0xff] %v994_v44  ;;  %1090 = vst [vmem:[%s1875_s25 + $0x138] sm:$0xff] %v1026_v21  ;;  %v463_v13 = vpop.permute.xlu1 %462 }
  0xf0   : > { %v995_v47 = vadd.f32 %v1732_v49, %v867_v46  ;;  %v1027_v14 = vadd.f32 %v1735_v50, %v899_v5  ;;  %v700_v48 = vpop.f32.mrf.mxu0  ;;  %v796_v38 = vpop.f32.mrf.mxu1 }
  0xf1   : > { %v996_v39 = vadd.f32 %v1738_v51, %v868_v8  ;;  %v1028_v40 = vadd.f32 %v1741_v52, %v900_v31  ;;  %v869_v33 = vmax.f32 %v699_v11, 0.0  ;;  %v901_v35 = vmax.f32 %v795_v37, 0.0 }
  0xf2   : > { %v701_v12 = vadd.f32 %v700_v48, %v1645_v15  ;;  %v797_v9 = vadd.f32 %v796_v38, %v453_v43  ;;  %v704_v30 = vpop.f32.mrf.mxu0  ;;  %v800_v32 = vpop.f32.mrf.mxu1  ;;  %1059 = vst [vmem:[%s1875_s25 + $0x40] sm:$0xff] %v995_v47  ;;  %1091 = vst [vmem:[%s1875_s25 + $0x140] sm:$0xff] %v1027_v14 }
  0xf3   : > { %v997_v49 = vadd.f32 %v1744_v53, %v869_v33  ;;  %v1029_v50 = vadd.f32 %v1747_v54, %v901_v35  ;;  %v705_v25 = vadd.f32 %v704_v30, %v1647_v16  ;;  %v801_v51 = vadd.f32 %v800_v32, %v458_v26  ;;  %1060 = vst [vmem:[%s1875_s25 + $0x48] sm:$0xff] %v996_v39  ;;  %v473_v47 = vpop.permute.xlu1 %472 }
  0xf4   : > { %1092 = vst [vmem:[%s1875_s25 + $0x148] sm:$0xff] %v1028_v40  ;;  %v870_v52 = vmax.f32 %v701_v12, 0.0  ;;  %v902_v41 = vmax.f32 %v797_v9, 0.0  ;;  %v706_v42 = vpop.f32.mrf.mxu0  ;;  %v802_v15 = vpop.f32.mrf.mxu1 }
  0xf5   : > { %v871_v10 = vmax.f32 %v705_v25, 0.0  ;;  %v903_v24 = vmax.f32 %v801_v51, 0.0  ;;  %v707_v27 = vadd.f32 %v706_v42, %v1647_v16  ;;  %v803_v28 = vadd.f32 %v802_v15, %v458_v26  ;;  %1061 = vst [vmem:[%s1875_s25 + $0x50] sm:$0xff] %v997_v49  ;;  %1093 = vst [vmem:[%s1875_s25 + $0x150] sm:$0xff] %v1029_v50  ;;  %v2100_v15 = vld [vmem:[#allocation9_spill] sm:$0xff] }
  0xf6   : > { %v998_v53 = vadd.f32 %v1750_v55, %v870_v52  ;;  %v1030_v54 = vadd.f32 %v1753_v56, %v902_v41  ;;  %v710_v29 = vpop.f32.mrf.mxu0  ;;  %v806_v22 = vpop.f32.mrf.mxu1 }
  0xf7   : > { %v999_v0 = vadd.f32 %v1756_v57, %v871_v10  ;;  %v1031_v20 = vadd.f32 %v1759_v58, %v903_v24  ;;  %v872_v23 = vmax.f32 %v707_v27, 0.0  ;;  %v904_v16 = vmax.f32 %v803_v28, 0.0  ;;  %v468_v55 = vpop.permute.xlu0 %467  ;;  %v2101_v24 = vld [vmem:[#allocation10_spill] sm:$0xff] }
  0xf8   : > { %v711_v34 = vadd.f32 %v710_v29, %v1649_v17  ;;  %v807_v43 = vadd.f32 %v806_v22, %v463_v13  ;;  %v712_v44 = vpop.f32.mrf.mxu0  ;;  %v808_v21 = vpop.f32.mrf.mxu1  ;;  %1062 = vst [vmem:[%s1875_s25 + $0x58] sm:$0xff] %v998_v53  ;;  %1094 = vst [vmem:[%s1875_s25 + $0x158] sm:$0xff] %v1030_v54  ;;  %v2102_v53 = vld [vmem:[#allocation2_spill] sm:$0xff] }
  0xf9   : > { %v1000_v56 = vadd.f32 %v1762_v59, %v872_v23  ;;  %v1032_v45 = vadd.f32 %v1765_v60, %v904_v16  ;;  %v713_v57 = vadd.f32 %v712_v44, %v1649_v17  ;;  %v809_v36 = vadd.f32 %v808_v21, %v463_v13  ;;  %1063 = vst [vmem:[%s1875_s25 + $0x60] sm:$0xff] %v999_v0  ;;  %v2103_v0 = vld [vmem:[#allocation11_spill] sm:$0xff]  ;;  %v2104_v23 = vld [vmem:[#allocation12_spill] sm:$0xff] }
  0xfa   : > { %1095 = vst [vmem:[%s1875_s25 + $0x160] sm:$0xff] %v1031_v20  ;;  %v873_v58 = vmax.f32 %v711_v34, 0.0  ;;  %v905_v46 = vmax.f32 %v807_v43, 0.0  ;;  %v716_v5 = vpop.f32.mrf.mxu0  ;;  %v812_v6 = vpop.f32.mrf.mxu1 }
  0xfb   : > { %v874_v7 = vmax.f32 %v713_v57, 0.0  ;;  %v906_v8 = vmax.f32 %v809_v36, 0.0  ;;  %v717_v31 = vadd.f32 %v716_v5, %v1651_v18  ;;  %v813_v11 = vadd.f32 %v812_v6, %v468_v55  ;;  %1064 = vst [vmem:[%s1875_s25 + $0x68] sm:$0xff] %v1000_v56  ;;  %1096 = vst [vmem:[%s1875_s25 + $0x168] sm:$0xff] %v1032_v45  ;;  %v478_v42 = vpop.permute.xlu0 %477  ;;  %v2105_v36 = vld [vmem:[#allocation3_spill] sm:$0xff]  ;;  %v2106_v5 = vld [vmem:[#allocation13_spill] sm:$0xff] }
  0xfc   : > { %v1001_v59 = vadd.f32 %v1768_v61, %v873_v58  ;;  %v1033_v17 = vadd.f32 %v1771_v62, %v905_v46  ;;  %v718_v60 = vpop.f32.mrf.mxu0  ;;  %v814_v37 = vpop.f32.mrf.mxu1 }
  0xfd   : > { %v1002_v14 = vadd.f32 %v1774_v63, %v874_v7  ;;  %v1034_v48 = vadd.f32 %v1777_v1, %v906_v8  ;;  %v875_v38 = vmax.f32 %v717_v31, 0.0  ;;  %v907_v26 = vmax.f32 %v813_v11, 0.0  ;;  %v2107_v7 = vld [vmem:[#allocation14_spill] sm:$0xff] }
  0xfe   : > { %v719_v39 = vadd.f32 %v718_v60, %v1651_v18  ;;  %v815_v40 = vadd.f32 %v814_v37, %v468_v55  ;;  %v722_v33 = vpop.f32.mrf.mxu0  ;;  %v818_v35 = vpop.f32.mrf.mxu1  ;;  %1065 = vst [vmem:[%s1875_s25 + $0x70] sm:$0xff] %v1001_v59  ;;  %1097 = vst [vmem:[%s1875_s25 + $0x170] sm:$0xff] %v1033_v17  ;;  %v2108_v17 = vld [vmem:[#allocation15_spill] sm:$0xff]  ;;  %v2109_v37 = vld [vmem:[#allocation16_spill] sm:$0xff] }
  0xff   : > { %v1003_v61 = vadd.f32 %v1780_v2, %v875_v38  ;;  %v1035_v62 = vadd.f32 %v1783_v3, %v907_v26  ;;  %v723_v12 = vadd.f32 %v722_v33, %v1653_v19  ;;  %v819_v63 = vadd.f32 %v818_v35, %v473_v47  ;;  %1066 = vst [vmem:[%s1875_s25 + $0x78] sm:$0xff] %v1002_v14  ;;  %v2099_v3 = vld [vmem:[#allocation8_spill] sm:$0xff]  ;;  %v488_v59 = vpop.permute.xlu0 %487  ;;  %v2110_v33 = vld [vmem:[#allocation17_spill] sm:$0xff] }
 0x100   : > { %1098 = vst [vmem:[%s1875_s25 + $0x178] sm:$0xff] %v1034_v48  ;;  %v876_v1 = vmax.f32 %v719_v39, 0.0  ;;  %v908_v9 = vmax.f32 %v815_v40, 0.0  ;;  %v724_v30 = vpop.f32.mrf.mxu0  ;;  %v820_v18 = vpop.f32.mrf.mxu1 }
 0x101   : > { %v877_v32 = vmax.f32 %v723_v12, 0.0  ;;  %v909_v49 = vmax.f32 %v819_v63, 0.0  ;;  %v725_v50 = vadd.f32 %v724_v30, %v1653_v19  ;;  %v821_v25 = vadd.f32 %v820_v18, %v473_v47  ;;  %1067 = vst [vmem:[%s1875_s25 + $0x80] sm:$0xff] %v1003_v61  ;;  %1099 = vst [vmem:[%s1875_s25 + $0x180] sm:$0xff] %v1035_v62  ;;  %v2111_v61 = vld [vmem:[#allocation18_spill] sm:$0xff]  ;;  %v2112_v12 = vld [vmem:[#allocation4_spill] sm:$0xff] }
 0x102   : > { %v1004_v2 = vadd.f32 %v1786_v4, %v876_v1  ;;  %v1036_v51 = vadd.f32 %v2099_v3, %v908_v9  ;;  %v728_v52 = vpop.f32.mrf.mxu0  ;;  %v824_v41 = vpop.f32.mrf.mxu1  ;;  %v2113_v3 = vld [vmem:[#allocation19_spill] sm:$0xff] }
 0x103   : > { %v1005_v10 = vadd.f32 %v2100_v15, %v877_v32  ;;  %v1037_v27 = vadd.f32 %v2101_v24, %v909_v49  ;;  %v878_v28 = vmax.f32 %v725_v50, 0.0  ;;  %v910_v19 = vmax.f32 %v821_v25, 0.0  ;;  %v483_v4 = vpop.permute.xlu1 %482  ;;  %v2115_v24 = vld [vmem:[#allocation21_spill] sm:$0xff] }
 0x104   : > { %v729_v54 = vadd.f32 %v728_v52, %v2102_v53  ;;  %v825_v29 = vadd.f32 %v824_v41, %v478_v42  ;;  %v730_v22 = vpop.f32.mrf.mxu0  ;;  %v826_v13 = vpop.f32.mrf.mxu1  ;;  %1068 = vst [vmem:[%s1875_s25 + $0x88] sm:$0xff] %v1004_v2  ;;  %1100 = vst [vmem:[%s1875_s25 + $0x188] sm:$0xff] %v1036_v51  ;;  %v2114_v52 = vld [vmem:[#allocation20_spill] sm:$0xff] }
 0x105   : > { %v1006_v20 = vadd.f32 %v2103_v0, %v878_v28  ;;  %v1038_v16 = vadd.f32 %v2104_v23, %v910_v19  ;;  %v731_v34 = vadd.f32 %v730_v22, %v2102_v53  ;;  %v827_v43 = vadd.f32 %v826_v13, %v478_v42  ;;  %1069 = vst [vmem:[%s1875_s25 + $0x90] sm:$0xff] %v1005_v10  ;;  %v2116_v28 = vld [vmem:[#allocation22_spill] sm:$0xff]  ;;  %v2118_v23 = vld [vmem:[#allocation23_spill] sm:$0xff] }
 0x106   : > { %1101 = vst [vmem:[%s1875_s25 + $0x190] sm:$0xff] %v1037_v27  ;;  %v879_v44 = vmax.f32 %v729_v54, 0.0  ;;  %v911_v21 = vmax.f32 %v825_v29, 0.0  ;;  %v734_v55 = vpop.f32.mrf.mxu0  ;;  %v830_v56 = vpop.f32.mrf.mxu1  ;;  %v2117_v29 = vld [vmem:[#allocation5_spill] sm:$0xff] }
 0x107   : > { %v880_v45 = vmax.f32 %v731_v34, 0.0  ;;  %v912_v57 = vmax.f32 %v827_v43, 0.0  ;;  %v735_v58 = vadd.f32 %v734_v55, %v2105_v36  ;;  %v831_v46 = vadd.f32 %v830_v56, %v483_v4  ;;  %1070 = vst [vmem:[%s1875_s25 + $0x98] sm:$0xff] %v1006_v20  ;;  %1102 = vst [vmem:[%s1875_s25 + $0x198] sm:$0xff] %v1038_v16  ;;  %v493_v10 = vpop.permute.xlu1 %492  ;;  %v498_v20 = vpop.permute.xlu0 %497  ;;  %v2119_v34 = vld [vmem:[#allocation24_spill] sm:$0xff] }
 0x108   : > { %v1007_v6 = vadd.f32 %v2106_v5, %v879_v44  ;;  %v1039_v8 = vadd.f32 %v2107_v7, %v911_v21  ;;  %v736_v31 = vpop.f32.mrf.mxu0  ;;  %v832_v11 = vpop.f32.mrf.mxu1  ;;  %v2121_v7 = vld [vmem:[#allocation25_spill] sm:$0xff] }
 0x109   : > { %v1008_v60 = vadd.f32 %v2108_v17, %v880_v45  ;;  %v1040_v47 = vadd.f32 %v2109_v37, %v912_v57  ;;  %v881_v14 = vmax.f32 %v735_v58, 0.0  ;;  %v913_v48 = vmax.f32 %v831_v46, 0.0  ;;  %v2120_v46 = vld [vmem:[#allocation6_spill] sm:$0xff]  ;;  %v2123_v37 = vld [vmem:[#allocation27_spill] sm:$0xff] }
 0x10a   : > { %v737_v38 = vadd.f32 %v736_v31, %v2105_v36  ;;  %v833_v26 = vadd.f32 %v832_v11, %v483_v4  ;;  %v740_v39 = vpop.f32.mrf.mxu0  ;;  %v836_v40 = vpop.f32.mrf.mxu1  ;;  %1071 = vst [vmem:[%s1875_s25 + $0xa0] sm:$0xff] %v1007_v6  ;;  %1103 = vst [vmem:[%s1875_s25 + $0x1a0] sm:$0xff] %v1039_v8  ;;  %v2122_v31 = vld [vmem:[#allocation26_spill] sm:$0xff] }
 0x10b   : > { %v1009_v35 = vadd.f32 %v2110_v33, %v881_v14  ;;  %v1041_v62 = vadd.f32 %v2111_v61, %v913_v48  ;;  %v741_v63 = vadd.f32 %v740_v39, %v2112_v12  ;;  %v837_v1 = vadd.f32 %v836_v40, %v488_v59  ;;  %1072 = vst [vmem:[%s1875_s25 + $0xa8] sm:$0xff] %v1008_v60  ;;  %v503_v60 = vpop.permute.xlu1 %502  ;;  %v2124_v14 = vld [vmem:[#allocation28_spill] sm:$0xff]  ;;  %v2125_v61 = vld [vmem:[#allocation29_spill] sm:$0xff] }
 0x10c   : > { %1104 = vst [vmem:[%s1875_s25 + $0x1a8] sm:$0xff] %v1040_v47  ;;  %v882_v9 = vmax.f32 %v737_v38, 0.0  ;;  %v914_v30 = vmax.f32 %v833_v26, 0.0  ;;  %v742_v18 = vpop.f32.mrf.mxu0  ;;  %v838_v32 = vpop.f32.mrf.mxu1 }
 0x10d   : > { %v883_v49 = vmax.f32 %v741_v63, 0.0  ;;  %v915_v50 = vmax.f32 %v837_v1, 0.0  ;;  %v743_v25 = vadd.f32 %v742_v18, %v2112_v12  ;;  %v839_v2 = vadd.f32 %v838_v32, %v488_v59  ;;  %1073 = vst [vmem:[%s1875_s25 + $0xb0] sm:$0xff] %v1009_v35  ;;  %1105 = vst [vmem:[%s1875_s25 + $0x1b0] sm:$0xff] %v1041_v62  ;;  %v2126_v12 = vld [vmem:[#allocation30_spill] sm:$0xff]  ;;  %v2127_v1 = vld [vmem:[#allocation7_spill] sm:$0xff] }
 0x10e   : > { %v1010_v51 = vadd.f32 %v2113_v3, %v882_v9  ;;  %v1042_v41 = vadd.f32 %v2114_v52, %v914_v30  ;;  %v746_v42 = vpop.f32.mrf.mxu0  ;;  %v842_v15 = vpop.f32.mrf.mxu1  ;;  %v2128_v52 = vld [vmem:[#allocation31_spill] sm:$0xff] }
 0x10f   : > { %v1011_v27 = vadd.f32 %v2115_v24, %v883_v49  ;;  %v1043_v19 = vadd.f32 %v2116_v28, %v915_v50  ;;  %v884_v53 = vmax.f32 %v743_v25, 0.0  ;;  %v916_v54 = vmax.f32 %v839_v2, 0.0 }
 0x110   : > { %v747_v22 = vadd.f32 %v746_v42, %v2117_v29  ;;  %v843_v13 = vadd.f32 %v842_v15, %v493_v10  ;;  %v748_v4 = vpop.f32.mrf.mxu0  ;;  %v844_v0 = vpop.f32.mrf.mxu1  ;;  %1074 = vst [vmem:[%s1875_s25 + $0xb8] sm:$0xff] %v1010_v51  ;;  %1106 = vst [vmem:[%s1875_s25 + $0x1b8] sm:$0xff] %v1042_v41  ;;  %v2129_v42 = vld [vmem:[#allocation32_spill] sm:$0xff] }
 0x111   : > { %v1012_v16 = vadd.f32 %v2118_v23, %v884_v53  ;;  %v1044_v43 = vadd.f32 %v2119_v34, %v916_v54  ;;  %v749_v44 = vadd.f32 %v748_v4, %v2117_v29  ;;  %v845_v21 = vadd.f32 %v844_v0, %v493_v10  ;;  %1075 = vst [vmem:[%s1875_s25 + $0xc0] sm:$0xff] %v1011_v27  ;;  %v2130_v10 = vld [vmem:[#allocation33_spill] sm:$0xff]  ;;  %v2131_v27 = vld [vmem:[#allocation34_spill] sm:$0xff]  ;;  %v2132_v54 = vld [vmem:[#allocation35_spill] sm:$0xff] }
 0x112   : > { %1107 = vst [vmem:[%s1875_s25 + $0x1c0] sm:$0xff] %v1043_v19  ;;  %v885_v55 = vmax.f32 %v747_v22, 0.0  ;;  %v917_v56 = vmax.f32 %v843_v13, 0.0  ;;  %v752_v45 = vpop.f32.mrf.mxu0  ;;  %v848_v57 = vpop.f32.mrf.mxu1  ;;  %v2133_v22 = vld [vmem:[#allocation36_spill] sm:$0xff] }
 0x113   : > { %v886_v36 = vmax.f32 %v749_v44, 0.0  ;;  %v918_v58 = vmax.f32 %v845_v21, 0.0  ;;  %v753_v5 = vadd.f32 %v752_v45, %v2120_v46  ;;  %v849_v6 = vadd.f32 %v848_v57, %v498_v20  ;;  %1076 = vst [vmem:[%s1875_s25 + $0xc8] sm:$0xff] %v1012_v16  ;;  %1108 = vst [vmem:[%s1875_s25 + $0x1c8] sm:$0xff] %v1044_v43 }
 0x114   : > { %v1013_v8 = vadd.f32 %v2121_v7, %v885_v55  ;;  %v1045_v11 = vadd.f32 %v2122_v31, %v917_v56  ;;  %v754_v59 = vpop.f32.mrf.mxu0  ;;  %v850_v17 = vpop.f32.mrf.mxu1 }
 0x115   : > { %v1014_v47 = vadd.f32 %v2123_v37, %v886_v36  ;;  %v1046_v48 = vadd.f32 %v2124_v14, %v918_v58  ;;  %v887_v38 = vmax.f32 %v753_v5, 0.0  ;;  %v919_v26 = vmax.f32 %v849_v6, 0.0 }
 0x116   : > { %v755_v39 = vadd.f32 %v754_v59, %v2120_v46  ;;  %v851_v40 = vadd.f32 %v850_v17, %v498_v20  ;;  %v758_v33 = vpop.f32.mrf.mxu0  ;;  %v854_v35 = vpop.f32.mrf.mxu1  ;;  %1077 = vst [vmem:[%s1875_s25 + $0xd0] sm:$0xff] %v1013_v8  ;;  %1109 = vst [vmem:[%s1875_s25 + $0x1d0] sm:$0xff] %v1045_v11 }
 0x117   : > { %v1015_v62 = vadd.f32 %v2125_v61, %v887_v38  ;;  %v1047_v63 = vadd.f32 %v2126_v12, %v919_v26  ;;  %v759_v9 = vadd.f32 %v758_v33, %v2127_v1  ;;  %v855_v30 = vadd.f32 %v854_v35, %v503_v60  ;;  %1078 = vst [vmem:[%s1875_s25 + $0xd8] sm:$0xff] %v1014_v47 }
 0x118   : > { %1110 = vst [vmem:[%s1875_s25 + $0x1d8] sm:$0xff] %v1046_v48  ;;  %v888_v18 = vmax.f32 %v755_v39, 0.0  ;;  %v920_v32 = vmax.f32 %v851_v40, 0.0  ;;  %v760_v49 = vpop.f32.mrf.mxu0  ;;  %v856_v50 = vpop.f32.mrf.mxu1 }
 0x119   : > { %v889_v25 = vmax.f32 %v759_v9, 0.0  ;;  %v921_v2 = vmax.f32 %v855_v30, 0.0  ;;  %v761_v3 = vadd.f32 %v760_v49, %v2127_v1  ;;  %v857_v51 = vadd.f32 %v856_v50, %v503_v60  ;;  %1079 = vst [vmem:[%s1875_s25 + $0xe0] sm:$0xff] %v1015_v62  ;;  %1111 = vst [vmem:[%s1875_s25 + $0x1e0] sm:$0xff] %v1047_v63 }
 0x11a   : > { %v1016_v41 = vadd.f32 %v2128_v52, %v888_v18  ;;  %v1048_v15 = vadd.f32 %v2129_v42, %v920_v32 }
 0x11b   : > { %v1017_v24 = vadd.f32 %v2130_v10, %v889_v25  ;;  %v1049_v28 = vadd.f32 %v2131_v27, %v921_v2  ;;  %v890_v19 = vmax.f32 %v761_v3, 0.0  ;;  %v922_v53 = vmax.f32 %v857_v51, 0.0 }
 0x11c   : > { %1080 = vst [vmem:[%s1875_s25 + $0xe8] sm:$0xff] %v1016_v41  ;;  %1112 = vst [vmem:[%s1875_s25 + $0x1e8] sm:$0xff] %v1048_v15 }
 0x11d   : > { %v1018_v29 = vadd.f32 %v2132_v54, %v890_v19  ;;  %v1050_v13 = vadd.f32 %v2133_v22, %v922_v53  ;;  %1081 = vst [vmem:[%s1875_s25 + $0xf0] sm:$0xff] %v1017_v24  ;;  %1113 = vst [vmem:[%s1875_s25 + $0x1f0] sm:$0xff] %v1049_v28 }
 0x11f   : > { %1082 = vst [vmem:[%s1875_s25 + $0xf8] sm:$0xff] %v1018_v29  ;;  %1114 = vst [vmem:[%s1875_s25 + $0x1f8] sm:$0xff] %v1050_v13 }
 0x120 PF: > { %s14_s17 = sadd.s32 1, %s1326_s17   ;;  %s2134_s15 = smov %s1322_s16 }
 0x121   : > { %p11_p5 = scmp.ge.s32.totalorder %s14_s17, 4   ;;  %s2135_s16 = smov %s2137_s18 }
 0x123   :  { %13 = sbr.rel (!%p11_p5) target bundleno = 2 (0x2), region = 69 }

</bundles_post_ra>
